<compile_context>
chip_gen: v7x
topology: tpu7x:2x2x1
jax: 0.10.0
libtpu: 0.0.40
codegen_flags: <defaults>
</compile_context>

<pallas_src>
import jax
import jax.numpy as jnp
from jax.experimental import pallas as pl
from jax.experimental.pallas import tpu as pltpu

LANE = 128  # TPU lane width; sample tiles are lane-dense multiples of this.


def gather_kernel(idx_ref, joint_ref, out_ref):
    """Per-tile lane-dense gather: out[m] = joint[idx_b[m], idx_a[m]]."""
    packed = idx_ref[0]                       # (1, T) int32: (B << 16) | A
    ib = packed >> 16                         # (1, T) conditioning value B
    ia = packed & 0xFFFF                      # (1, T) value A
    joint = joint_ref[...]                    # (N, N) f32, joint[b, a]

    N = joint.shape[0]
    T = packed.shape[1]

    rows = jax.lax.broadcasted_iota(jnp.int32, (N, T), 0)   # category id on sublanes
    onehot_a = (rows == ia).astype(jnp.float32)             # (N, T) one-hot of A per lane

    # Column gather on the MXU: colsel[b, m] = joint[b, idx_a[m]].
    # Precision.HIGHEST keeps the gathered f32 log-probs exact (the default
    # f32 decomposition could round them to ~bf16 accuracy).
    colsel = jax.lax.dot_general(
        joint, onehot_a,
        dimension_numbers=(((1,), (0,)), ((), ())),
        precision=jax.lax.Precision.HIGHEST,
        preferred_element_type=jnp.float32,
    )                                                        # (N, T)

    # Row gather via where-masked sublane reduce (NaN-safe): pick b = idx_b[m].
    res = jnp.sum(jnp.where(rows == ib, colsel, 0.0), axis=0, keepdims=True)  # (1, T)

    out_ref[0] = res


def _vmem_capacity_bytes():
    """Per-core VMEM capacity; falls back to the smallest (v7x, 64 MiB)."""
    try:
        return int(pltpu.get_tpu_info().vmem_capacity_bytes)
    except Exception:
        return 64 << 20


def _choose_tile_m(M, N, vmem_cap):
    """Largest lane-dense sample tile the VMEM budget allows (capped at 32K),
    with >= 2 balanced tiles for large M so the parallel axis can shard."""
    m_ceil = LANE * pl.cdiv(M, LANE)
    # Rough per-sample VMEM footprint of one grid step:
    #   double-buffered packed-index + output blocks (4 B each, x2 buffers) -> 16 B
    #   ~8 (N, T) f32 intermediates (iota, compares, one-hot, colsel, where, ...)
    per_sample = 16 + 8 * N * 4
    budget = int(0.55 * vmem_cap) - (4 << 20)   # slack for compiler scratch + table
    t = max(LANE, min(32 * 1024, budget // max(per_sample, 1)))
    t = (t // LANE) * LANE
    if m_ceil < 2 * 4096:
        # Small M: a single tile; splitting would only add grid-step overhead.
        return min(m_ceil, t)
    # Large M: at least 2 tiles (v7x megacore), balanced and <= the VMEM-sized cap.
    num_tiles = max(2, pl.cdiv(m_ceil, t))
    return LANE * pl.cdiv(m_ceil // LANE, num_tiles)


def model2_forward(inputs, w_B, w_A_B, *, tile_m=None):
    """inputs: (M, 2) int; w_B: (N,) f32; w_A_B: (N, N) f32. Returns (M,) f32."""
    M = inputs.shape[0]
    N = w_B.shape[0]
    assert N < (1 << 15), "index packing assumes N < 32768"

    vmem_cap = _vmem_capacity_bytes()
    if tile_m is None:
        tile_m = _choose_tile_m(M, N, vmem_cap)
    else:
        tile_m = max(LANE, LANE * pl.cdiv(int(tile_m), LANE))
        tile_m = min(tile_m, LANE * pl.cdiv(M, LANE))
    num_tiles = pl.cdiv(M, tile_m)
    M_pad = num_tiles * tile_m

    # --- fused joint log-prob table, computed once in plain JAX (tiny) ---
    logp_B = jax.nn.log_softmax(w_B.astype(jnp.float32))               # (N,)
    logp_A_B = jax.nn.log_softmax(w_A_B.astype(jnp.float32), axis=1)   # (N, N), rows = B
    logp_joint = logp_B[:, None] + logp_A_B                            # joint[b, a]
    # Clamp -inf so the MXU one-hot gather never sees -inf * 0 = NaN (see TODO above).
    logp_joint = jnp.maximum(logp_joint, jnp.finfo(jnp.float32).min)

    # --- pack both indices into one int32 per sample: (B << 16) | A ---
    idx_a = inputs[:, 0].astype(jnp.int32)
    idx_b = inputs[:, 1].astype(jnp.int32)
    packed = (idx_b << 16) | idx_a
    if M_pad != M:
        packed = jnp.pad(packed, (0, M_pad - M))   # padded samples gather joint[0,0];
                                                   # their outputs are sliced off below.
    idx = packed.reshape(num_tiles, 1, tile_m)     # lane-dense index stream

    # --- VMEM limit: actual footprint, generation-aware clamp ---
    est = (
        2 * (tile_m * 4)           # double-buffered packed-index blocks
        + 2 * (tile_m * 4)         # double-buffered output blocks
        + 2 * (N * N * 4)          # resident joint table
        + 8 * (N * tile_m * 4)     # in-kernel (N, T) temporaries
        + (4 << 20)                # compiler scratch slack
    )
    vmem_limit = int(min(max(est, 8 << 20), int(0.75 * vmem_cap)))

    out = pl.pallas_call(
        gather_kernel,
        out_shape=jax.ShapeDtypeStruct((num_tiles, 1, tile_m), jnp.float32),
        grid=(num_tiles,),
        in_specs=[
            pl.BlockSpec((1, 1, tile_m), lambda i: (i, 0, 0)),
            pl.BlockSpec((N, N), lambda i: (0, 0)),   # table stays resident across steps
        ],
        out_specs=pl.BlockSpec((1, 1, tile_m), lambda i: (i, 0, 0)),
        compiler_params=pltpu.CompilerParams(
            dimension_semantics=("parallel",),
            vmem_limit_bytes=vmem_limit,
        ),
    )(idx, logp_joint)

    return out.reshape(M_pad)[:M]


if __name__ == "__main__":
    key = jax.random.PRNGKey(0)
    k_wb, k_wab, k_a, k_b = jax.random.split(key, 4)

    N = 16     # number of categories
    M = 300    # number of samples (not a multiple of the tile -> exercises padding)

    # Deterministic synthetic parameters (Marginal p_B.w: (N,), Conditional p_A_B.w: (N, N)).
    w_B = jax.random.normal(k_wb, (N,), dtype=jnp.float32)
    w_A_B = jax.random.normal(k_wab, (N, N), dtype=jnp.float32)

    # Deterministic synthetic categorical samples, shape (M, 2): column 0 = A, column 1 = B.
    a = jax.random.randint(k_a, (M, 1), 0, N, dtype=jnp.int32)
    b = jax.random.randint(k_b, (M, 1), 0, N, dtype=jnp.int32)
    inputs = jnp.concatenate([a, b], axis=1)

    # Pure-JAX reference of the PyTorch Model2.forward.
    logp_B = jax.nn.log_softmax(w_B)
    logp_A_B = jax.nn.log_softmax(w_A_B, axis=1)
    ref = logp_B[inputs[:, 1]] + logp_A_B[inputs[:, 1], inputs[:, 0]]

    # 1) auto tile size (single lane-dense tile for this small M)
    out = jax.block_until_ready(model2_forward(inputs, w_B, w_A_B))
    assert out.shape == (M,)
    assert jnp.allclose(out, ref, atol=1e-5, rtol=1e-5)

    # 2) forced small tile -> exercises the multi-tile grid path + last-tile padding
    out2 = jax.block_until_ready(model2_forward(inputs, w_B, w_A_B, tile_m=128))
    assert jnp.allclose(out2, ref, atol=1e-5, rtol=1e-5)

    print("KERNEL_OK")
</pallas_src>

<mosaic_0001>
module attributes {stable_mosaic.version = 11 : i64} {
  func.func @gather_kernel(%arg0: i32, %arg1: memref<1x1x384xi32, #tpu.memory_space<vmem>>, %arg2: memref<16x16xf32, #tpu.memory_space<vmem>>, %arg3: memref<1x1x384xf32, #tpu.memory_space<vmem>>) attributes {dimension_semantics = [#tpu.dimension_semantics<parallel>], iteration_bounds = array<i64: 1>, scalar_prefetch = 0 : i64, scratch_operands = 0 : i64, tpu.core_type = #tpu.core_type<tc>, window_params = [{transform_indices = @transform_0, window_bounds = array<i64: 1, 1, 384>}, {pipeline_mode = #tpu.pipeline_mode<synchronous>, transform_indices = @transform_1, window_bounds = array<i64: 16, 16>}, {transform_indices = @transform_2, window_bounds = array<i64: 1, 1, 384>}]} {
    %c0 = arith.constant 0 : index
    %c0_0 = arith.constant 0 : index
    %c0_1 = arith.constant 0 : index
    %0 = vector.load %arg1[%c0, %c0_0, %c0_1] : memref<1x1x384xi32, #tpu.memory_space<vmem>>, vector<1x1x384xi32>
    %1 = vector.shape_cast %0 : vector<1x1x384xi32> to vector<1x384xi32>
    %c16_i32 = arith.constant 16 : i32
    %2 = vector.broadcast %c16_i32 : i32 to vector<1x384xi32>
    %3 = arith.shrsi %1, %2 : vector<1x384xi32>
    %c65535_i32 = arith.constant 65535 : i32
    %4 = vector.broadcast %c65535_i32 : i32 to vector<1x384xi32>
    %5 = arith.andi %1, %4 : vector<1x384xi32>
    %c0_2 = arith.constant 0 : index
    %c0_3 = arith.constant 0 : index
    %6 = vector.load %arg2[%c0_2, %c0_3] : memref<16x16xf32, #tpu.memory_space<vmem>>, vector<16x16xf32>
    %7 = tpu.iota {dimensions = array<i32: 0>} : vector<16x384xi32>
    %8 = vector.broadcast %5 : vector<1x384xi32> to vector<16x384xi32>
    %9 = arith.cmpi eq, %7, %8 : vector<16x384xi32>
    %10 = arith.extui %9 : vector<16x384xi1> to vector<16x384xi32>
    %11 = arith.sitofp %10 : vector<16x384xi32> to vector<16x384xf32>
    %cst = arith.constant dense<0.000000e+00> : vector<16x384xf32>
    %12 = tpu.matmul %6, %11, %cst {dimension_numbers = #tpu.dot_dimension_numbers<[1], [0], [0], [1], [0, 0, 1, 1], [], []>, precision = #tpu.contract_precision<fp32>} : vector<16x16xf32>, vector<16x384xf32>, vector<16x384xf32> -> vector<16x384xf32>
    %13 = vector.broadcast %3 : vector<1x384xi32> to vector<16x384xi32>
    %14 = arith.cmpi eq, %7, %13 : vector<16x384xi32>
    %cst_4 = arith.constant 0.000000e+00 : f32
    %15 = vector.broadcast %cst_4 : f32 to vector<16x384xf32>
    %16 = arith.select %14, %12, %15 : vector<16x384xi1>, vector<16x384xf32>
    %cst_5 = arith.constant dense<0.000000e+00> : vector<384xf32>
    %17 = vector.multi_reduction <add>, %16, %cst_5 [0] : vector<16x384xf32> to vector<384xf32>
    %18 = vector.shape_cast %17 : vector<384xf32> to vector<1x384xf32>
    %c0_6 = arith.constant 0 : index
    %c0_7 = arith.constant 0 : index
    %c0_8 = arith.constant 0 : index
    %19 = vector.load %arg3[%c0_6, %c0_7, %c0_8] : memref<1x1x384xf32, #tpu.memory_space<vmem>>, vector<1x1x384xf32>
    %20 = vector.shape_cast %19 : vector<1x1x384xf32> to vector<1x384xf32>
    %21 = vector.shape_cast %18 : vector<1x384xf32> to vector<1x1x384xf32>
    tpu.vector_store %arg3[%c0_6, %c0_7, %c0_8], %21 {strides = array<i32>} : memref<1x1x384xf32, #tpu.memory_space<vmem>>, vector<1x1x384xf32>,
    return
  }
  func.func @transform_0(%arg0: i32) -> (i32, i32, i32) {
    %c0_i32 = arith.constant 0 : i32
    %c0_i32_0 = arith.constant 0 : i32
    %c0_i32_1 = arith.constant 0 : i32
    return %arg0, %c0_i32, %c0_i32_0 : i32, i32, i32
  }
  func.func @transform_1(%arg0: i32) -> (i32, i32) {
    %c0_i32 = arith.constant 0 : i32
    %c0_i32_0 = arith.constant 0 : i32
    %c0_i32_1 = arith.constant 0 : i32
    return %c0_i32, %c0_i32_0 : i32, i32
  }
  func.func @transform_2(%arg0: i32) -> (i32, i32, i32) {
    %c0_i32 = arith.constant 0 : i32
    %c0_i32_0 = arith.constant 0 : i32
    %c0_i32_1 = arith.constant 0 : i32
    return %arg0, %c0_i32, %c0_i32_0 : i32, i32, i32
  }
}

</mosaic_0001>

<bundles_post_ra>
// kernel: tpu_custom_call.1
= control target key start
LH: loop header
LB: loop body
LE: loop exit
PB: predicated region body
PF: predicated region fallthrough
CT: control target
= control target key end

     0   :  { %7 = vsyncpa [#allocation3], 0  ;;  %s1702_s0 = inlined_call_operand.hbm [shape: s32[1,1,384], index: 0, kind: input, shape index: {}]   ;;  %s1703_s1 = inlined_call_operand.hbm [shape: f32[16,16], index: 1, kind: input, shape index: {}]   ;;  %s1704_s2 = inlined_call_operand.hbm [shape: f32[1,1,384], index: 2, kind: output, shape index: {}]  }
   0x1   :  { %8 = vsyncpa [#allocation6], 0 }
   0x2   :  { %9 = vsyncpa [#allocation4], 0  ;;  %s1468_s9 = smov [#allocation2]   ;;  %s1469_s11 = smov [#allocation5]  }
   0x3   :  { %s16_s10 = sshll.u32 %s1468_s9, 4  ;;  %s25_s12 = sshll.u32 %s1469_s11, 4  ;;  %s17_s10 = int_to_ptr.vmem [resolvable:$true] %s16_s10  ;;  %s1491_s12 = int_to_ptr.vmem [resolvable:$true] %s25_s12 }
   0x4   :  { %s1396_s15 = scalar_lea.hbm %s1702_s0, 48 }
   0x5   :  { %p1397_p0 = scmp.ne.s32.totalorder %s1702_s0, %s1396_s15  ;;  %p1400_p1 = scmp.lt.u32.totalorder %s1396_s15, %s1702_s0 }
   0x7   :  { %p1402_p2 = pnand %p1400_p1, %p1397_p0 }
   0x9   :  { %1405 = shalt.err (!%p1402_p2)
}
   0xa   :  { %s1406_s20 = scalar_lea.vmem %s17_s10, 48  ;;  %s1410_s21 = scalar_lea.vmem %s17_s10, 64 }
   0xb   :  { %p1407_p3 = scmp.ne.s32.totalorder %s17_s10, %s1406_s20  ;;  %p1411_p4 = scmp.lt.s32.totalorder %s17_s10, %s17_s10 }
   0xc   :  { %p1412_p5 = scmp.lt.s32.totalorder %s1410_s21, %s1406_s20 }
   0xe   :  { %p1413_p6 = por %p1412_p5, %p1411_p4 }
  0x10   :  { %p1414_p7 = pnand %p1413_p6, %p1407_p3 }
  0x12   :  { %1417 = shalt.err (!%p1414_p7)
}
  0x13   :  { %19 = dma.hbm_to_vmem [thread:$0]  %s1702_s0, 48, %s17_s10, [#allocation3]  }
  0x14   :  { %s1418_s26 = scalar_lea.hbm %s1703_s1, 256 }
  0x15   :  { %p1419_p8 = scmp.ne.s32.totalorder %s1703_s1, %s1418_s26  ;;  %p1422_p9 = scmp.lt.u32.totalorder %s1418_s26, %s1703_s1 }
  0x17   :  { %p1424_p10 = pnand %p1422_p9, %p1419_p8 }
  0x19   :  { %1427 = shalt.err (!%p1424_p10)
}
  0x1a   :  { %s1428_s3 = scalar_lea.vmem %s1491_s12, 256  ;;  %p1433_p12 = scmp.lt.s32.totalorder %s1491_s12, %s1491_s12 }
  0x1b   :  { %p1429_p11 = scmp.ne.s32.totalorder %s1491_s12, %s1428_s3  ;;  %p1434_p13 = scmp.lt.s32.totalorder %s1428_s3, %s1428_s3 }
  0x1d   :  { %p1435_p0 = por %p1434_p13, %p1433_p12 }
  0x1f   :  { %p1436_p1 = pnand %p1435_p0, %p1429_p11 }
  0x21   :  { %1439 = shalt.err (!%p1436_p1)
}
  0x22   :  { %s1470_s0 = smov 128   ;;  %s1471_s4 = smov 8  }
  0x23   :  { %31 = dma.hbm_to_vmem [thread:$0]  %s1703_s1, 256, %s1491_s12, [#allocation6], %s1470_s0, %s1470_s0, %s1471_s4  }
  0x24   :  { %1462 = dma.done.wait [#allocation3], 48  }
  0x25   :  { %1463 = vsyncadd [#allocation3], 4294967248 }
  0x26   :  { %1464 = dma.done.wait [#allocation6], 256  }
  0x27   :  { %1465 = vsyncadd [#allocation6], 4294967040  ;;  %v43_v0 = vlaneseq  ;;  %v1472_v1 = vmov 0.0   ;;  %vm76_vm0 = vcmask 130048   ;;  %v1529_v5 = vld [vmem:[#allocation2] sm:$0x7] }
  0x28   :  { %151 = vmatprep.mubr.f32.mxu1 %v1472_v1  ;;  %258 = vmatprep.mubr.f32.mxu0 %v1472_v1  ;;  %v41_v6 = vld [vmem:[#allocation5] sm:$0xff]  ;;  %v42_v7 = vld [vmem:[#allocation5 + $0x8] sm:$0xff]  ;;  %v40_v9 = vand.u32 65535, %v1529_v5  ;;  %v1473_v25 = vmov 1.0|1.0   ;;  %s1475_s1 = smov [#allocation7]  }
  0x29   :  { %v1525_v2 = vshrl.u32 %v43_v0, 7  ;;  %v78_v11 = vsel %vm76_vm0, %v41_v6, 0  ;;  %v81_v12 = vsel %vm76_vm0, %v42_v7, 0  ;;  %s1208_s7 = sshll.u32 %s1475_s1, 4  ;;  %vm1199_vm0 = vcmp.lt.s32.totalorder %v43_v0, 384  ;;  %s1209_s7 = int_to_ptr.vmem [resolvable:$true] %s1208_s7 }
  0x2a   :  { %v1536_v13 = vand.u32 4294901760, %v78_v11  ;;  %v1538_v14 = vand.u32 4294901760, %v81_v12  ;;  %s1440_s8 = scalar_lea.vmem %s1209_s7, 48  ;;  %s1444_s9 = scalar_lea.vmem %s1209_s7, 64 }
  0x2b   :  { %v52_v3 = vsub.s32 1, %v1525_v2  ;;  %v48_v4 = vsub.s32 0, %v1525_v2  ;;  %v56_v8 = vsub.s32 2, %v1525_v2  ;;  %v1534_v10 = vadd.s32 8, %v1525_v2  ;;  %p1441_p2 = scmp.ne.s32.totalorder %s1209_s7, %s1440_s8  ;;  %p1445_p3 = scmp.lt.s32.totalorder %s1209_s7, %s1209_s7 }
  0x2c   :  { %v1545_v17 = vsub.f32 %v78_v11, %v1536_v13  ;;  %v1548_v18 = vsub.f32 %v81_v12, %v1538_v14  ;;  %p1446_p4 = scmp.lt.s32.totalorder %s1444_s9, %s1440_s8 }
  0x2d   :  { %v53_v15 = vrot.slane %v40_v9, %v52_v3  ;;  %v49_v16 = vrot.slane %v40_v9, %v48_v4  ;;  %v57_v19 = vrot.slane %v40_v9, %v56_v8 }
  0x2e   :  { %v1581_v31 = vand.u32 4294901760, %v1545_v17  ;;  %v1584_v32 = vand.u32 4294901760, %v1548_v18  ;;  %p1447_p5 = por %p1446_p4, %p1445_p3 }
  0x2f   :  { %vm59_vm1 = vcmp.eq.s32.totalorder %v1525_v2, %v53_v15  ;;  %vm62_vm2 = vcmp.eq.s32.totalorder %v1534_v10, %v53_v15  ;;  %vm58_vm3 = vcmp.eq.s32.totalorder %v1525_v2, %v49_v16  ;;  %vm61_vm4 = vcmp.eq.s32.totalorder %v1534_v10, %v49_v16 }
  0x30   :  { %v1219_v20 = vsel %vm59_vm1, 1.0, %v1472_v1  ;;  %v1222_v21 = vsel %vm62_vm2, 1.0, %v1472_v1  ;;  %vm1558_vm5 = vmpackc.low %vm62_vm2, %vm59_vm1  ;;  %v1218_v23 = vsel %vm58_vm3, 1.0, %v1472_v1  ;;  %v1221_v24 = vsel %vm61_vm4, 1.0, %v1472_v1  ;;  %p1448_p6 = pnand %p1447_p5, %p1441_p2 }
  0x31   :  { %1309 = vmatprep.subr.msk.bf16.mxu1 %vm1558_vm5, %v1473_v25  ;;  %v1567_v26 = vsub.f32 %v1219_v20, %v1219_v20  ;;  %v187_v27 = vsub.f32 %v1222_v21, %v1222_v21  ;;  %vm1569_vm6 = vmpackc.low %vm61_vm4, %vm58_vm3  ;;  %v1573_v29 = vsub.f32 %v1218_v23, %v1218_v23  ;;  %v1575_v30 = vsub.f32 %v1221_v24, %v1221_v24 }
  0x32   :  { %1311 = vmatpush1.bf16.msk.msra.mxu1 %vm1569_vm6, %v1473_v25  ;;  %vm60_vm7 = vcmp.eq.s32.totalorder %v1525_v2, %v57_v19  ;;  %vm63_vm8 = vcmp.eq.s32.totalorder %v1534_v10, %v57_v19  ;;  %v155_v37 = vsub.f32 %v1545_v17, %v1581_v31  ;;  %v166_v38 = vsub.f32 %v1548_v18, %v1584_v32 }
  0x33   :  { %v176_v33 = vand.u32 4294901760, %v1567_v26  ;;  %v188_v34 = vand.u32 4294901760, %v187_v27  ;;  %v182_v35 = vand.u32 4294901760, %v1573_v29  ;;  %v194_v36 = vand.u32 4294901760, %v1575_v30  ;;  %vm1610_vm9 = vmpackc.low %vm63_vm8, %vm60_vm7 }
  0x34   :  { %v1220_v39 = vsel %vm60_vm7, 1.0, %v1472_v1  ;;  %v1223_v40 = vsel %vm63_vm8, 1.0, %v1472_v1  ;;  %v156_v45 = vand.u32 4294901760, %v155_v37  ;;  %v167_v52 = vand.u32 4294901760, %v166_v38 }
  0x35   :  { %v177_v41 = vsub.f32 %v1567_v26, %v176_v33  ;;  %v189_v42 = vsub.f32 %v187_v27, %v188_v34  ;;  %v183_v43 = vsub.f32 %v1573_v29, %v182_v35  ;;  %v195_v44 = vsub.f32 %v1575_v30, %v194_v36 }
  0x36   :  { %v712_v46 = vsub.f32 %v1220_v39, %v1220_v39  ;;  %v719_v47 = vsub.f32 %v1223_v40, %v1223_v40  ;;  %157 = vmatmul.mubr.f32.vlgmr.msra.gmra.mrb[0].mxu1 %v156_v45  ;;  %v1316_v57 = vpack.c.bf16 %v187_v27, %v1567_v26  ;;  %v1318_v61 = vpack.c.bf16 %v1575_v30, %v1573_v29 }
  0x37   :  { %v178_v48 = vand.u32 4294901760, %v177_v41  ;;  %v190_v49 = vand.u32 4294901760, %v189_v42  ;;  %v184_v50 = vand.u32 4294901760, %v183_v43  ;;  %v196_v51 = vand.u32 4294901760, %v195_v44  ;;  %162 = vmatprep.mubr.f32.mxu1 %v1472_v1 }
  0x38   :  { %v713_v53 = vand.u32 4294901760, %v712_v46  ;;  %v720_v54 = vand.u32 4294901760, %v719_v47  ;;  %v1340_v7 = vpack.c.bf16 %v719_v47, %v712_v46  ;;  %v1324_v9 = vpack.c.bf16 %v188_v34, %v176_v33 }
  0x39   :  { %v1312_v55 = vpack.c.bf16 %v190_v49, %v178_v48  ;;  %v1314_v56 = vpack.c.bf16 %v196_v51, %v184_v50  ;;  %v1326_v11 = vpack.c.bf16 %v194_v36, %v182_v35  ;;  %v1474_v48 = vmov 1966171168  }
  0x3a   :  { %v714_v58 = vsub.f32 %v712_v46, %v713_v53  ;;  %v721_v59 = vsub.f32 %v719_v47, %v720_v54  ;;  %168 = vmatmul.mubr.f32.gmra.mrb[2].mxu1 %v167_v52  ;;  %v1348_v12 = vpack.c.bf16 %v720_v54, %v713_v53  ;;  %v1175_v49 = vunpack.c.l.s4 %v1474_v48 }
  0x3b   :  { %1313 = vmatprep.subr.bf16.mxu0 %v1312_v55  ;;  %1356 = vmatprep.subr.bf16.mxu1 %v1312_v55 }
  0x3c   :  { %1315 = vmatpush1.bf16.msra.mxu0 %v1314_v56  ;;  %1357 = vmatpush1.bf16.msra.mxu1 %v1314_v56  ;;  %v715_v62 = vand.u32 4294901760, %v714_v58  ;;  %v722_v63 = vand.u32 4294901760, %v721_v59 }
  0x3d   :  { %265 = vmatprep.mubr.f32.mxu1 %v1472_v1  ;;  %1333 = vmatprep.subr.msk.bf16.mxu1 %vm1610_vm9, %v1473_v25 }
  0x3e   :  { %1317 = vmatprep.subr.bf16.mxu0 %v1316_v57  ;;  %v1336_v6 = vpack.c.bf16 %v722_v63, %v715_v62 }
  0x3f   :  { %260 = vmatmul.mubr.f32.vlgmr.msra.gmra.mrb[0].mxu0 %v1536_v13 }
  0x40   :  { %1319 = vmatpush1.bf16.msra.mxu0 %v1318_v61  ;;  %345 = vmatprep.mubr.f32.mxu0 %v1472_v1 }
  0x41   :  { %1321 = vmatprep.subr.msk.bf16.mxu0 %vm1558_vm5, %v1473_v25 }
  0x42   :  { %267 = vmatmul.mubr.f32.vlgmr.msra.gmra.mrb[2].mxu1 %v1538_v14 }
  0x43   :  { %1335 = vmatpush3.bf16.msk.msra.mxu1 %vm1610_vm9, %v1473_v25  ;;  %1270 = vmatprep.mubr.f32.mxu1 %v156_v45 }
  0x44   :  { %1337 = vmatprep.subr.bf16.mxu1 %v1336_v6 }
  0x46   :  { %1271 = vmatmul.mubr.f32.vlgmr.msra.gmra.mrb[4].mxu1 %v167_v52 }
  0x47   :  { %348 = vmatmul.mubr.f32.vlgmr.msra.gmra.mrb[0].mxu0 %v1545_v17  ;;  %1339 = vmatpush3.bf16.msra.mxu1 %v1336_v6 }
  0x48   :  { %353 = vmatprep.mubr.f32.mxu0 %v1472_v1  ;;  %1323 = vmatpush1.bf16.msk.msra.mxu0 %vm1569_vm6, %v1473_v25 }
  0x49   :  { %1277 = vmatprep.mubr.f32.mxu1 %v1536_v13  ;;  %1341 = vmatprep.subr.bf16.mxu1 %v1340_v7 }
  0x4a   :  { %1325 = vmatprep.subr.bf16.mxu0 %v1324_v9 }
  0x4b   :  { %356 = vmatmul.mubr.f32.gmra.mrb[2].mxu0 %v1548_v18 }
  0x4c   :  { %430 = vmatprep.mubr.f32.mxu0 %v1472_v1 }
  0x4e   :  { %1278 = vmatmul.mubr.f32.vlgmr.msra.gmra.mrb[4].mxu1 %v1538_v14 }
  0x4f   :  { %434 = vmatmul.mubr.f32.vlgmr.msra.gmra.mrb[0].mxu0 %v1581_v31  ;;  %1343 = vmatpush3.bf16.msra.mxu1 %v1340_v7 }
  0x50   :  { %439 = vmatprep.mubr.f32.mxu0 %v1472_v1  ;;  %1327 = vmatpush1.bf16.msra.mxu0 %v1326_v11 }
  0x51   :  { %1284 = vmatprep.mubr.f32.mxu1 %v1545_v17  ;;  %1345 = vmatprep.subr.msk.bf16.mxu1 %vm1610_vm9, %v1473_v25 }
  0x52   :  { %1329 = vmatprep.subr.msk.bf16.mxu0 %vm1558_vm5, %v1473_v25 }
  0x53   :  { %443 = vmatmul.mubr.f32.gmra.mrb[2].mxu0 %v1584_v32 }
  0x54   :  { %525 = vmatprep.mubr.f32.mxu0 %v1472_v1 }
  0x56   :  { %1285 = vmatmul.mubr.f32.vlgmr.msra.gmra.mrb[4].mxu1 %v1548_v18  ;;  %v39_v18 = vshra.s32 %v1529_v5, 16 }
  0x57   :  { %527 = vmatmul.mubr.f32.vlgmr.msra.gmra.mrb[0].mxu0 %v1536_v13  ;;  %1347 = vmatpush3.bf16.msk.msra.mxu1 %vm1610_vm9, %v1473_v25 }
  0x58   :  { %532 = vmatprep.mubr.f32.mxu0 %v1472_v1  ;;  %1331 = vmatpush1.bf16.msk.msra.mxu0 %vm1569_vm6, %v1473_v25  ;;  %v1128_v20 = vrot.slane %v39_v18, %v48_v4  ;;  %v1132_v23 = vrot.slane %v39_v18, %v52_v3 }
  0x59   :  { %1291 = vmatprep.mubr.f32.mxu1 %v1581_v31  ;;  %1349 = vmatprep.subr.bf16.mxu1 %v1348_v12 }
  0x5a   :  { %vm1137_vm10 = vcmp.eq.s32.totalorder %v1525_v2, %v1128_v20  ;;  %vm1140_vm11 = vcmp.eq.s32.totalorder %v1534_v10, %v1128_v20  ;;  %vm1138_vm12 = vcmp.eq.s32.totalorder %v1525_v2, %v1132_v23  ;;  %vm1141_vm13 = vcmp.eq.s32.totalorder %v1534_v10, %v1132_v23 }
  0x5b   :  { %534 = vmatmul.mubr.f32.gmra.mrb[2].mxu0 %v1538_v14 }
  0x5c   :  { %608 = vmatprep.mubr.f32.mxu0 %v1472_v1 }
  0x5e   :  { %1292 = vmatmul.mubr.f32.vlgmr.msra.gmra.mrb[4].mxu1 %v1584_v32  ;;  %v1136_v32 = vrot.slane %v39_v18, %v56_v8 }
  0x5f   :  { %610 = vmatmul.mubr.f32.vlgmr.msra.gmra.mrb[0].mxu0 %v1536_v13  ;;  %1351 = vmatpush3.bf16.msra.mxu1 %v1348_v12 }
  0x60   :  { %615 = vmatprep.mubr.f32.mxu0 %v1472_v1  ;;  %1298 = vmatprep.mubr.f32.mxu1 %v1536_v13  ;;  %vm1142_vm14 = vcmp.eq.s32.totalorder %v1534_v10, %v1136_v32  ;;  %vm1139_vm15 = vcmp.eq.s32.totalorder %v1525_v2, %v1136_v32  ;;  %v1176_v10 = vunpack.c.0.s8 %v1175_v49 }
  0x61   :  { %1353 = vmatprep.subr.msk.bf16.mxu1 %vm1610_vm9, %v1473_v25 }
  0x62   :  { %v1179_v55 = vsub.s32 %v1176_v10, %v1525_v2 }
  0x63   :  { %617 = vmatmul.mubr.f32.gmra.mrb[2].mxu0 %v1538_v14 }
  0x66   :  { %1299 = vmatmul.mubr.f32.vlgmr.msra.gmra.mrb[4].mxu1 %v1538_v14 }
  0x67   :  { %1355 = vmatpush3.bf16.msk.msra.mxu1 %vm1610_vm9, %v1473_v25  ;;  %1305 = vmatprep.mubr.f32.mxu1 %v1536_v13 }
  0x6e   :  { %1306 = vmatmul.mubr.f32.vlgmr.msra.gmra.mrb[4].mxu1 %v1538_v14 }
 0x109   :  { %v158_v1 = vpop.f32.mrb[0].mxu1 }
 0x10a   :  { %v160_v15 = vpop.f32.mrb[1].mxu1 }
 0x115   :  { %v268_v16 = vpop.f32.mrb[2].mxu1 }
 0x116   :  { %v270_v17 = vpop.f32.mrb[3].mxu1 }
 0x132   :  { %v611_v19 = vpop.f32.mrb[0].mxu0 }
 0x133   :  { %v1358_v21 = vadd.f32 %v611_v19, %v158_v1  ;;  %v613_v22 = vpop.f32.mrb[1].mxu0 }
 0x134   :  { %v1359_v24 = vadd.f32 %v613_v22, %v160_v15 }
 0x135   :  { %v1143_v26 = vsel %vm1137_vm10, %v1358_v21, 0.0 }
 0x136   :  { %v618_v13 = vpop.f32.mrb[2].mxu0  ;;  %v1144_v27 = vsel %vm1138_vm12, %v1359_v24, 0.0 }
 0x137   :  { %v1360_v14 = vadd.f32 %v618_v13, %v268_v16  ;;  %v620_v25 = vpop.f32.mrb[3].mxu0 }
 0x138   :  { %v1361_v5 = vadd.f32 %v620_v25, %v270_v17 }
 0x139   :  { %v1146_v4 = vsel %vm1140_vm11, %v1360_v14, 0.0 }
 0x13a   :  { %v1149_v28 = vadd.f32 %v1146_v4, %v1143_v26  ;;  %v1147_v29 = vsel %vm1141_vm13, %v1361_v5, 0.0 }
 0x13b   :  { %v1156_v30 = vadd.f32 %v1147_v29, %v1144_v27 }
 0x13c   :  { %v1150_v3 = vrot.slane %v1149_v28, 4 }
 0x13d   :  { %v1157_v31 = vrot.slane %v1156_v30, 4 }
 0x13e   :  { %v1151_v33 = vadd.f32 %v1150_v3, %v1149_v28 }
 0x13f   :  { %v1158_v34 = vadd.f32 %v1157_v31, %v1156_v30 }
 0x140   :  { %v1152_v35 = vrot.slane %v1151_v33, 2 }
 0x141   :  { %v1159_v36 = vrot.slane %v1158_v34, 2  ;;  %v1307_v39 = vpop.f32.mrb[4].mxu1 }
 0x142   :  { %v1153_v37 = vadd.f32 %v1152_v35, %v1151_v33  ;;  %v1148_v41 = vsel %vm1142_vm14, %v1307_v39, 0.0  ;;  %v1115_v42 = vpop.f32.mrb[5].mxu1 }
 0x143   :  { %v1160_v38 = vadd.f32 %v1159_v36, %v1158_v34  ;;  %v1145_v44 = vsel %vm1139_vm15, %v1115_v42, 0.0 }
 0x144   :  { %v1154_v40 = vrot.slane %v1153_v37, 1  ;;  %v1163_v46 = vadd.f32 %v1148_v41, %v1145_v44 }
 0x145   :  { %v1161_v43 = vrot.slane %v1160_v38, 1 }
 0x146   :  { %v1155_v45 = vadd.f32 %v1154_v40, %v1153_v37  ;;  %v1164_v8 = vrot.slane %v1163_v46, 4 }
 0x147   :  { %v1162_v47 = vadd.f32 %v1161_v43, %v1160_v38 }
 0x148   :  { %v1165_v51 = vadd.f32 %v1164_v8, %v1163_v46 }
 0x149   :  { %v1173_v50 = vcombine.low %v1155_v45, %v1162_v47 }
 0x14a   :  { %v1166_v52 = vrot.slane %v1165_v51, 2 }
 0x14b   :  { %v1180_v58 = vrot.slane %v1173_v50, %v1179_v55 }
 0x14c   :  { %v1167_v53 = vadd.f32 %v1166_v52, %v1165_v51 }
 0x14e   :  { %v1168_v54 = vrot.slane %v1167_v53, 1 }
 0x150   :  { %v1169_v56 = vadd.f32 %v1168_v54, %v1167_v53 }
 0x152   :  { %v1187_v57 = vrot.slane %v1169_v56, %v1179_v55 }
 0x154   :  { %v1188_v59 = vcombine.low %v1180_v58, %v1187_v57 }
 0x156   :  { %v1195_v60 = vrot.slane %v1188_v59, %v1179_v55 }
 0x158   :  { %1201 = vst.msk [vmem:[#allocation7] sm:$0x7] %vm1199_vm0, %v1195_v60 }
 0x159   :  { %1451 = shalt.err (!%p1448_p6)
}
 0x15a   :  { %s1452_s12 = scalar_lea.hbm %s1704_s2, 48 }
 0x15b   :  { %p1453_p7 = scmp.ne.s32.totalorder %s1704_s2, %s1452_s12  ;;  %p1456_p8 = scmp.lt.u32.totalorder %s1452_s12, %s1704_s2 }
 0x15d   :  { %p1458_p9 = pnand %p1456_p8, %p1453_p7 }
 0x15f   :  { %1461 = shalt.err (!%p1458_p9)
}
 0x160   :  { %1211 = dma.vmem_to_hbm [thread:$0]  %s1209_s7, 48, %s1704_s2, [#allocation4]  }
 0x161   :  { %1466 = dma.done.wait [#allocation4], 48  }
 0x162   :  { %1467 = vsyncadd [#allocation4], 4294967248 }
 0x163   :  { %1215 = vsyncpa [#allocation3], 1 }
 0x164   :  { %1216 = vsyncpa [#allocation6], 1 }
 0x165   :  { %1217 = vsyncpa [#allocation4], 1 }

</bundles_post_ra>
